<compile_context>
chip_gen: v5e
topology: v5e:2x2
jax: 0.10.0
libtpu: 0.0.40
codegen_flags: <defaults>
</compile_context>

<pallas_src>
import functools

import jax
import jax.numpy as jnp
from jax.experimental import pallas as pl
from jax.experimental.pallas import tpu as pltpu


def _fold_add(out_ref, v):
    """out_ref: (8, L) f32 VMEM ref.  out_ref += sublane-fold of v (R, L)."""
    R = v.shape[0]
    full = R // 8
    rem = R - full * 8
    if full > 0:
        s = v[0:8, :]
        for k in range(1, full):
            s = s + v[k * 8:(k + 1) * 8, :]
        out_ref[...] += s
        if rem:
            out_ref[0:rem, :] += v[full * 8:R, :]
    else:
        out_ref[0:R, :] += v


def _mixed_loss_kernel(x_ref, t_ref, o_ce_ref, o_in_ref, *,
                       chunk, n_valid, needs_mask):
    """Grid = (batch, shard, tile).  For every pixel of the current tile:
         o_ce += -log softmax(logits)[target]
         o_in +=  softmax(logits)[target]
       folded into (8, 128) output blocks that stay resident across the tile
       axis (classic accumulator pattern)."""
    C, TS, L = x_ref.shape
    n_chunks = TS // chunk
    j = pl.program_id(2)

    @pl.when(j == 0)
    def _init():
        o_ce_ref[...] = jnp.zeros_like(o_ce_ref)
        o_in_ref[...] = jnp.zeros_like(o_in_ref)

    tile_idx = pl.program_id(1) * pl.num_programs(2) + j
    last_tile = pl.num_programs(1) * pl.num_programs(2) - 1

    def do_chunk(r0, masked):
        tgt = t_ref[pl.ds(r0, chunk), :]                          # (chunk, L) i32
        xs = [x_ref[c, pl.ds(r0, chunk), :].astype(jnp.float32)
              for c in range(C)]                                  # C x (chunk, L)
        m = xs[0]
        for c in range(1, C):
            m = jnp.maximum(m, xs[c])
        se = None
        x_t = xs[0]                                               # target logit
        for c in range(C):
            e = jnp.exp(xs[c] - m)
            se = e if se is None else se + e
            if c > 0:
                x_t = jnp.where(tgt == c, xs[c], x_t)
        neg_logp_t = (m - x_t) + jnp.log(se)                      # -log p[target]
        p_t = jnp.exp(-neg_logp_t)                                # p[target]
        if masked:
            rows = jax.lax.broadcasted_iota(jnp.int32, (chunk, L), 0)
            lanes = jax.lax.broadcasted_iota(jnp.int32, (chunk, L), 1)
            pix = (tile_idx * TS + r0 + rows) * L + lanes         # pixel index
            valid = pix < n_valid
            neg_logp_t = jnp.where(valid, neg_logp_t, 0.0)
            p_t = jnp.where(valid, p_t, 0.0)
        _fold_add(o_ce_ref, neg_logp_t)
        _fold_add(o_in_ref, p_t)

    def run(masked):
        if n_chunks == 1:
            do_chunk(0, masked)
        else:
            def body(k, carry):
                do_chunk(pl.multiple_of(k * chunk, chunk), masked)
                return carry
            jax.lax.fori_loop(0, n_chunks, body, 0, unroll=2)

    if needs_mask:
        # Only the globally-last tile contains padded pixels.
        @pl.when(tile_idx < last_tile)
        def _bulk():
            run(False)

        @pl.when(tile_idx == last_tile)
        def _tail():
            run(True)
    else:
        run(False)


def _plan_tiles(P, target_rows, lanes=128):
    """Return (tile_rows, n_tiles, padded_pixel_count)."""
    pr = -(-P // lanes)                                   # pixel rows needed
    if P % lanes == 0:
        if pr <= target_rows:
            return pr, 1, P                               # one full-extent tile
        d = (min(target_rows, pr) // 8) * 8
        while d >= 64:                                    # reject tiny tiles
            if pr % d == 0:
                return d, pr // d, P
            d -= 8
    # Rare fallback (H*W not lane-aligned or awkward row count): pad + mask.
    ts = max(8, (min(target_rows, -(-pr // 8) * 8) // 8) * 8)
    n_tiles = -(-pr // ts)
    return ts, n_tiles, n_tiles * ts * lanes


def _choose_chunk(ts, C):
    """Rows per inner chunk: keeps C*(chunk/8) live logit vregs well under 64."""
    cap = max(8, min(128, ((256 // max(C, 1)) // 8) * 8))
    if ts <= cap:
        return ts
    d = cap
    while d >= 8:                                         # aligned divisor
        if ts % d == 0:
            return d
        d -= 8
    d = cap
    while d > 1:                                          # any divisor (rare)
        if ts % d == 0:
            return d
        d -= 1
    return 1


def _pixel_partials(x, t, n_valid, tile_rows, tiles_per_shard, chunk, needs_mask):
    """x: (B, C, PR, 128) logits; t: (B, PR, 128) int32 targets."""
    B, C, PR, L = x.shape
    tps = tiles_per_shard
    S = PR // (tps * tile_rows)

    kernel = functools.partial(_mixed_loss_kernel, chunk=chunk,
                               n_valid=n_valid, needs_mask=needs_mask)

    return pl.pallas_call(
        kernel,
        out_shape=(jax.ShapeDtypeStruct((B, S, 8, L), jnp.float32),
                   jax.ShapeDtypeStruct((B, S, 8, L), jnp.float32)),
        grid_spec=pltpu.PrefetchScalarGridSpec(
            num_scalar_prefetch=0,
            grid=(B, S, tps),
            in_specs=[
                pl.BlockSpec((None, C, tile_rows, L),
                             lambda b, s, j: (b, 0, s * tps + j, 0)),
                pl.BlockSpec((None, tile_rows, L),
                             lambda b, s, j: (b, s * tps + j, 0)),
            ],
            out_specs=(
                pl.BlockSpec((None, None, 8, L), lambda b, s, j: (b, s, 0, 0)),
                pl.BlockSpec((None, None, 8, L), lambda b, s, j: (b, s, 0, 0)),
            ),
        ),
        compiler_params=pltpu.CompilerParams(
            dimension_semantics=("parallel", "parallel", "arbitrary"),
            vmem_limit_bytes=32 * 1024 * 1024),
    )(x, t)


@functools.partial(jax.jit, static_argnames=("alpha", "gamma", "focal_alpha"))
def mixed_loss(logits_nchw, target_nhw, alpha=10.0, gamma=2.0, focal_alpha=0.25):
    B, C, H, W = logits_nchw.shape
    P = H * W                      # pixels per image
    N = B * P                      # total pixels
    L = 128

    # Free (contiguous) reshapes - no HBM transpose, keep the model's dtype.
    x = logits_nchw.reshape(B, C, P)
    t = target_nhw.reshape(B, P).astype(jnp.int32)
    # TODO(synk): accept uint8 targets end-to-end to cut target HBM traffic 4x
    # on DMA-bound v5e.

    itemsize = jnp.dtype(logits_nchw.dtype).itemsize
    # ~2 MiB of logits per grid step (amortizes ~0.35us/step, sits on the HBM
    # roofline); 2048-row cap keeps bf16 inputs at 2 MiB/step too.
    target_rows = int(max(8, min(2048, (2 * 1024 * 1024) // (C * L * itemsize))))

    ts, n_tiles, p_pad = _plan_tiles(P, target_rows, L)
    needs_mask = p_pad != P
    if needs_mask:
        # Rare path only (H*W not a multiple of 128 or an awkward row count);
        # common power-of-two spatial shapes never pay this HBM copy.
        x = jnp.pad(x, ((0, 0), (0, 0), (0, p_pad - P)))
        t = jnp.pad(t, ((0, 0), (0, p_pad - P)))

    # Split the tile axis across cores when there is no batch parallelism,
    # so both TensorCores on 2-TC parts (v7x) get work.
    S = 2 if (B == 1 and n_tiles >= 2 and n_tiles % 2 == 0) else 1
    tps = n_tiles // S

    x = x.reshape(B, C, n_tiles * ts, L)
    t = t.reshape(B, n_tiles * ts, L)
    chunk = _choose_chunk(ts, C)

    ce_parts, in_parts = _pixel_partials(x, t, P, ts, tps, chunk, needs_mask)

    sum_neg_logp = jnp.sum(ce_parts)    # sum over pixels of -log p[target]
    intersection = jnp.sum(in_parts)    # sum over pixels of p[target]
    n_f = jnp.float32(N)                # == iflat.sum() == tflat.sum()

    # Focal loss (CrossEntropyLoss with mean reduction over all pixels).
    ce = sum_neg_logp / n_f
    pt = jnp.exp(-ce)
    focal = focal_alpha * (1.0 - pt) ** gamma * ce

    # Dice "score" exactly as in the reference (its -log is added).
    smooth = 1.0
    dice = (2.0 * intersection + smooth) / (n_f + n_f + smooth)

    loss = alpha * focal - jnp.log(dice)
    return loss  # scalar; .mean() in the reference is a no-op on a scalar


def _mixed_loss_reference(logits, target, alpha=10.0, gamma=2.0, focal_alpha=0.25):
    """Pure-JAX reference mirroring the PyTorch module."""
    B, C, H, W = logits.shape
    logp = jax.nn.log_softmax(logits.astype(jnp.float32), axis=1)
    onehot = jax.nn.one_hot(target, C, axis=1, dtype=jnp.float32)
    ce = -jnp.mean(jnp.sum(onehot * logp, axis=1))
    pt = jnp.exp(-ce)
    focal = focal_alpha * (1.0 - pt) ** gamma * ce
    p = jax.nn.softmax(logits.astype(jnp.float32), axis=1)
    smooth = 1.0
    inter = jnp.sum(p * onehot)
    dice = (2.0 * inter + smooth) / (jnp.sum(p) + jnp.sum(onehot) + smooth)
    return alpha * focal - jnp.log(dice)


if __name__ == "__main__":
    key = jax.random.PRNGKey(0)
    k1, k2 = jax.random.split(key)

    B, C, H, W = 2, 4, 16, 16
    logits = jax.random.normal(k1, (B, C, H, W), dtype=jnp.float32)
    target = jax.random.randint(k2, (B, H, W), 0, C, dtype=jnp.int32)

    out = mixed_loss(logits, target)
    out = jax.block_until_ready(out)

    ref = _mixed_loss_reference(logits, target)
    assert jnp.allclose(out, ref, rtol=1e-5, atol=1e-5), (out, ref)

    print("KERNEL_OK")
</pallas_src>

<mosaic_0001>
module attributes {stable_mosaic.version = 11 : i64} {
  func.func @_mixed_loss_kernel(%arg0: i32, %arg1: i32, %arg2: i32, %arg3: memref<1x4x2x128xf32, #tpu.memory_space<vmem>>, %arg4: memref<1x2x128xi32, #tpu.memory_space<vmem>>, %arg5: memref<1x1x8x128xf32, #tpu.memory_space<vmem>>, %arg6: memref<1x1x8x128xf32, #tpu.memory_space<vmem>>) attributes {dimension_semantics = [#tpu.dimension_semantics<parallel>, #tpu.dimension_semantics<parallel>, #tpu.dimension_semantics<arbitrary>], iteration_bounds = array<i64: 2, 1, 1>, scalar_prefetch = 0 : i64, scratch_operands = 0 : i64, tpu.core_type = #tpu.core_type<tc>, window_params = [{transform_indices = @transform_0, window_bounds = array<i64: 1, 4, 2, 128>}, {transform_indices = @transform_1, window_bounds = array<i64: 1, 2, 128>}, {transform_indices = @transform_2, window_bounds = array<i64: 1, 1, 8, 128>}, {transform_indices = @transform_3, window_bounds = array<i64: 1, 1, 8, 128>}]} {
    %c0_i32 = arith.constant 0 : i32
    %0 = arith.cmpi eq, %arg2, %c0_i32 : i32
    %1 = arith.extui %0 : i1 to i32
    %c0_i32_0 = arith.constant 0 : i32
    %2 = arith.cmpi ne, %1, %c0_i32_0 : i32
    scf.if %2 {
      %cst_32 = arith.constant 0.000000e+00 : f32
      %54 = vector.broadcast %cst_32 : f32 to vector<8x128xf32>
      %c0_33 = arith.constant 0 : index
      %c0_34 = arith.constant 0 : index
      %c0_35 = arith.constant 0 : index
      %c0_36 = arith.constant 0 : index
      %55 = vector.load %arg5[%c0_33, %c0_34, %c0_35, %c0_36] : memref<1x1x8x128xf32, #tpu.memory_space<vmem>>, vector<1x1x8x128xf32>
      %56 = vector.shape_cast %55 : vector<1x1x8x128xf32> to vector<8x128xf32>
      %57 = vector.shape_cast %54 : vector<8x128xf32> to vector<1x1x8x128xf32>
      tpu.vector_store %arg5[%c0_33, %c0_34, %c0_35, %c0_36], %57 {strides = array<i32>} : memref<1x1x8x128xf32, #tpu.memory_space<vmem>>, vector<1x1x8x128xf32>,
      %cst_37 = arith.constant 0.000000e+00 : f32
      %58 = vector.broadcast %cst_37 : f32 to vector<8x128xf32>
      %c0_38 = arith.constant 0 : index
      %c0_39 = arith.constant 0 : index
      %c0_40 = arith.constant 0 : index
      %c0_41 = arith.constant 0 : index
      %59 = vector.load %arg6[%c0_38, %c0_39, %c0_40, %c0_41] : memref<1x1x8x128xf32, #tpu.memory_space<vmem>>, vector<1x1x8x128xf32>
      %60 = vector.shape_cast %59 : vector<1x1x8x128xf32> to vector<8x128xf32>
      %61 = vector.shape_cast %58 : vector<8x128xf32> to vector<1x1x8x128xf32>
      tpu.vector_store %arg6[%c0_38, %c0_39, %c0_40, %c0_41], %61 {strides = array<i32>} : memref<1x1x8x128xf32, #tpu.memory_space<vmem>>, vector<1x1x8x128xf32>,
    } else {
    }
    %c0 = arith.constant 0 : index
    %c0_1 = arith.constant 0 : index
    %c0_2 = arith.constant 0 : index
    %3 = vector.load %arg4[%c0, %c0_1, %c0_2] : memref<1x2x128xi32, #tpu.memory_space<vmem>>, vector<1x2x128xi32>
    %4 = vector.shape_cast %3 : vector<1x2x128xi32> to vector<2x128xi32>
    %c0_3 = arith.constant 0 : index
    %c0_4 = arith.constant 0 : index
    %c0_5 = arith.constant 0 : index
    %c0_6 = arith.constant 0 : index
    %5 = vector.load %arg3[%c0_3, %c0_4, %c0_5, %c0_6] : memref<1x4x2x128xf32, #tpu.memory_space<vmem>>, vector<1x1x2x128xf32>
    %6 = vector.shape_cast %5 : vector<1x1x2x128xf32> to vector<2x128xf32>
    %c0_7 = arith.constant 0 : index
    %c1 = arith.constant 1 : index
    %c0_8 = arith.constant 0 : index
    %c0_9 = arith.constant 0 : index
    %7 = vector.load %arg3[%c0_7, %c1, %c0_8, %c0_9] : memref<1x4x2x128xf32, #tpu.memory_space<vmem>>, vector<1x1x2x128xf32>
    %8 = vector.shape_cast %7 : vector<1x1x2x128xf32> to vector<2x128xf32>
    %c0_10 = arith.constant 0 : index
    %c2 = arith.constant 2 : index
    %c0_11 = arith.constant 0 : index
    %c0_12 = arith.constant 0 : index
    %9 = vector.load %arg3[%c0_10, %c2, %c0_11, %c0_12] : memref<1x4x2x128xf32, #tpu.memory_space<vmem>>, vector<1x1x2x128xf32>
    %10 = vector.shape_cast %9 : vector<1x1x2x128xf32> to vector<2x128xf32>
    %c0_13 = arith.constant 0 : index
    %c3 = arith.constant 3 : index
    %c0_14 = arith.constant 0 : index
    %c0_15 = arith.constant 0 : index
    %11 = vector.load %arg3[%c0_13, %c3, %c0_14, %c0_15] : memref<1x4x2x128xf32, #tpu.memory_space<vmem>>, vector<1x1x2x128xf32>
    %12 = vector.shape_cast %11 : vector<1x1x2x128xf32> to vector<2x128xf32>
    %13 = arith.maximumf %6, %8 : vector<2x128xf32>
    %14 = arith.maximumf %13, %10 : vector<2x128xf32>
    %15 = arith.maximumf %14, %12 : vector<2x128xf32>
    %16 = arith.subf %6, %15 : vector<2x128xf32>
    %17 = math.exp %16 : vector<2x128xf32>
    %18 = arith.subf %8, %15 : vector<2x128xf32>
    %19 = math.exp %18 : vector<2x128xf32>
    %20 = arith.addf %17, %19 : vector<2x128xf32>
    %c1_i32 = arith.constant 1 : i32
    %21 = vector.broadcast %c1_i32 : i32 to vector<2x128xi32>
    %22 = arith.cmpi eq, %4, %21 : vector<2x128xi32>
    %23 = arith.select %22, %8, %6 : vector<2x128xi1>, vector<2x128xf32>
    %24 = arith.subf %10, %15 : vector<2x128xf32>
    %25 = math.exp %24 : vector<2x128xf32>
    %26 = arith.addf %20, %25 : vector<2x128xf32>
    %c2_i32 = arith.constant 2 : i32
    %27 = vector.broadcast %c2_i32 : i32 to vector<2x128xi32>
    %28 = arith.cmpi eq, %4, %27 : vector<2x128xi32>
    %29 = arith.select %28, %10, %23 : vector<2x128xi1>, vector<2x128xf32>
    %30 = arith.subf %12, %15 : vector<2x128xf32>
    %31 = math.exp %30 : vector<2x128xf32>
    %32 = arith.addf %26, %31 : vector<2x128xf32>
    %c3_i32 = arith.constant 3 : i32
    %33 = vector.broadcast %c3_i32 : i32 to vector<2x128xi32>
    %34 = arith.cmpi eq, %4, %33 : vector<2x128xi32>
    %35 = arith.select %34, %12, %29 : vector<2x128xi1>, vector<2x128xf32>
    %36 = arith.subf %15, %35 : vector<2x128xf32>
    %37 = math.log %32 : vector<2x128xf32>
    %38 = arith.addf %36, %37 : vector<2x128xf32>
    %cst = arith.constant 0.000000e+00 : f32
    %39 = vector.broadcast %cst : f32 to vector<2x128xf32>
    %40 = arith.subf %39, %38 : vector<2x128xf32>
    %41 = math.exp %40 : vector<2x128xf32>
    %c0_16 = arith.constant 0 : index
    %c0_17 = arith.constant 0 : index
    %c0_18 = arith.constant 0 : index
    %c0_19 = arith.constant 0 : index
    %42 = vector.load %arg5[%c0_16, %c0_17, %c0_18, %c0_19] : memref<1x1x8x128xf32, #tpu.memory_space<vmem>>, vector<1x1x2x128xf32>
    %43 = vector.shape_cast %42 : vector<1x1x2x128xf32> to vector<2x128xf32>
    %44 = arith.addf %43, %38 : vector<2x128xf32>
    %c0_20 = arith.constant 0 : index
    %c0_21 = arith.constant 0 : index
    %c0_22 = arith.constant 0 : index
    %c0_23 = arith.constant 0 : index
    %45 = vector.load %arg5[%c0_20, %c0_21, %c0_22, %c0_23] : memref<1x1x8x128xf32, #tpu.memory_space<vmem>>, vector<1x1x2x128xf32>
    %46 = vector.shape_cast %45 : vector<1x1x2x128xf32> to vector<2x128xf32>
    %47 = vector.shape_cast %44 : vector<2x128xf32> to vector<1x1x2x128xf32>
    tpu.vector_store %arg5[%c0_20, %c0_21, %c0_22, %c0_23], %47 {strides = array<i32>} : memref<1x1x8x128xf32, #tpu.memory_space<vmem>>, vector<1x1x2x128xf32>,
    %c0_24 = arith.constant 0 : index
    %c0_25 = arith.constant 0 : index
    %c0_26 = arith.constant 0 : index
    %c0_27 = arith.constant 0 : index
    %48 = vector.load %arg6[%c0_24, %c0_25, %c0_26, %c0_27] : memref<1x1x8x128xf32, #tpu.memory_space<vmem>>, vector<1x1x2x128xf32>
    %49 = vector.shape_cast %48 : vector<1x1x2x128xf32> to vector<2x128xf32>
    %50 = arith.addf %49, %41 : vector<2x128xf32>
    %c0_28 = arith.constant 0 : index
    %c0_29 = arith.constant 0 : index
    %c0_30 = arith.constant 0 : index
    %c0_31 = arith.constant 0 : index
    %51 = vector.load %arg6[%c0_28, %c0_29, %c0_30, %c0_31] : memref<1x1x8x128xf32, #tpu.memory_space<vmem>>, vector<1x1x2x128xf32>
    %52 = vector.shape_cast %51 : vector<1x1x2x128xf32> to vector<2x128xf32>
    %53 = vector.shape_cast %50 : vector<2x128xf32> to vector<1x1x2x128xf32>
    tpu.vector_store %arg6[%c0_28, %c0_29, %c0_30, %c0_31], %53 {strides = array<i32>} : memref<1x1x8x128xf32, #tpu.memory_space<vmem>>, vector<1x1x2x128xf32>,
    return
  }
  func.func @transform_0(%arg0: i32, %arg1: i32, %arg2: i32) -> (i32, i32, i32, i32) {
    %c1_i32 = arith.constant 1 : i32
    %0 = arith.muli %arg1, %c1_i32 : i32
    %1 = arith.addi %0, %arg2 : i32
    %c0_i32 = arith.constant 0 : i32
    %c0_i32_0 = arith.constant 0 : i32
    %c0_i32_1 = arith.constant 0 : i32
    return %arg0, %c0_i32, %1, %c0_i32_0 : i32, i32, i32, i32
  }
  func.func @transform_1(%arg0: i32, %arg1: i32, %arg2: i32) -> (i32, i32, i32) {
    %c1_i32 = arith.constant 1 : i32
    %0 = arith.muli %arg1, %c1_i32 : i32
    %1 = arith.addi %0, %arg2 : i32
    %c0_i32 = arith.constant 0 : i32
    %c0_i32_0 = arith.constant 0 : i32
    return %arg0, %1, %c0_i32 : i32, i32, i32
  }
  func.func @transform_2(%arg0: i32, %arg1: i32, %arg2: i32) -> (i32, i32, i32, i32) {
    %c0_i32 = arith.constant 0 : i32
    %c0_i32_0 = arith.constant 0 : i32
    %c0_i32_1 = arith.constant 0 : i32
    return %arg0, %arg1, %c0_i32, %c0_i32_0 : i32, i32, i32, i32
  }
  func.func @transform_3(%arg0: i32, %arg1: i32, %arg2: i32) -> (i32, i32, i32, i32) {
    %c0_i32 = arith.constant 0 : i32
    %c0_i32_0 = arith.constant 0 : i32
    %c0_i32_1 = arith.constant 0 : i32
    return %arg0, %arg1, %c0_i32, %c0_i32_0 : i32, i32, i32, i32
  }
}

</mosaic_0001>

<bundles_post_ra>
// kernel: mixed_loss.1
= control target key start
LH: loop header
LB: loop body
LE: loop exit
PB: predicated region body
PF: predicated region fallthrough
CT: control target
= control target key end

     0   :  { %s553_s12 = smov 0   ;;  %s555_s13 = smov 0   ;;  %s602_s0 = inlined_call_operand.vmem [shape: f32[2,4,2,128], index: 0, kind: input, shape index: {}]   ;;  %s603_s1 = inlined_call_operand.vmem [shape: s32[2,2,128], index: 1, kind: input, shape index: {}]   ;;  %s604_s2 = inlined_call_operand.vmem [shape: f32[2,1,8,128], index: 2, kind: output, shape index: {0}]   ;;  %s605_s3 = inlined_call_operand.vmem [shape: f32[2,1,8,128], index: 3, kind: output, shape index: {1}]  }
   0x1   :  { %s557_s14 = smov 0  }
   0x2 LB: > { %s33_s15 = sadd.s32 1, %s526_s13  ;;  %p459_p0 = scmp.ge.s32.totalorder %s530_s14, 1  ;;  %s530_s14 = sphi %s557_s14, %s14_s14   ;;  %s526_s13 = sphi %s555_s13, %s607_s13   ;;  %s522_s12 = sphi %s553_s12, %s606_s12  }
   0x3   : > { %p35_p1 = scmp.ge.s32.totalorder %s33_s15, 2  ;;  %p190_p2 = scmp.lt.s32.totalorder %s530_s14, 3 }
   0x5   : > { %s609_s15 = smov (%p35_p1, %s33_s15), 0  ;;  %p191_p3 = pnand %p459_p0, %p190_p2 }
   0x6   : > { %p236_p4 = scmp.lt.s32.totalorder (!%p191_p3), %s522_s12, 1 }
   0x7   : > { %194 = sbr.rel (%p191_p3) target bundleno = 65 (0x41), region = 28 }
   0xc   : > { %s611_s12 = smov (!%p236_p4, %s522_s12), 1  ;;  %v532_v2 = vmov 0.0  }
   0xd   : > { %s470_s16 = sshll.u32 %s611_s12, 3  ;;  %s462_s26 = sshll.u32 %s611_s12, 1 }
   0xe   : > { %s243_s19 = scalar_lea.vmem %s602_s0, %s470_s16  ;;  %s577_s22 = scalar_lea.vmem %s604_s2, %s470_s16 }
   0xf   : > { %v275_v0 = vld [vmem:[%s243_s19] sm:$0x3]  ;;  %v465_v1 = vld [vmem:[%s243_s19 + $0x2] sm:$0x3]  ;;  %s582_s25 = scalar_lea.vmem %s605_s3, %s470_s16  ;;  %272 = vst [vmem:[%s577_s22] sm:$0xff] %v532_v2  ;;  %v466_v3 = vld [vmem:[%s243_s19 + $0x4] sm:$0x3]  ;;  %s252_s29 = scalar_lea.vmem %s603_s1, %s462_s26 }
  0x10   : > { %v282_v4 = vmax.f32 %v275_v0, %v465_v1  ;;  %v467_v5 = vld [vmem:[%s243_s19 + $0x6] sm:$0x3]  ;;  %273 = vst [vmem:[%s582_s25] sm:$0xff] %v532_v2  ;;  %v274_v16 = vld [vmem:[%s252_s29] sm:$0x3] }
  0x11   : > { %vm292_vm0 = vcmp.eq.s32.totalorder %v274_v16, 1  ;;  %vm298_vm1 = vcmp.eq.s32.totalorder %v274_v16, 2  ;;  %vm304_vm2 = vcmp.eq.s32.totalorder %v274_v16, 3 }
  0x12   : > { %v283_v6 = vmax.f32 %v282_v4, %v466_v3  ;;  %v293_v22 = vsel %vm292_vm0, %v465_v1, %v275_v0 }
  0x13   : > { %v299_v25 = vsel %vm298_vm1, %v466_v3, %v293_v22 }
  0x14   : > { %v284_v7 = vmax.f32 %v283_v6, %v467_v5  ;;  %v305_v26 = vsel %vm304_vm2, %v467_v5, %v299_v25 }
  0x16   : > { %v285_v8 = vsub.f32 %v275_v0, %v284_v7  ;;  %v288_v9 = vsub.f32 %v465_v1, %v284_v7  ;;  %v294_v10 = vsub.f32 %v466_v3, %v284_v7  ;;  %v300_v11 = vsub.f32 %v467_v5, %v284_v7  ;;  %v313_v30 = vld [vmem:[%s577_s22] sm:$0x3] }
  0x17   : > { %v306_v27 = vsub.f32 %v284_v7, %v305_v26  ;;  %v316_v35 = vld [vmem:[%s582_s25] sm:$0x3] }
  0x18   : > { %v286_v12 = vmul.f32 1.442695, %v285_v8  ;;  %v289_v13 = vmul.f32 1.442695, %v288_v9  ;;  %v295_v14 = vmul.f32 1.442695, %v294_v10 }
  0x19   : > { %v301_v15 = vmul.f32 1.442695, %v300_v11 }
  0x1a   : > { %496 = vpow2.f32 %v286_v12 }
  0x1b   : > { %498 = vpow2.f32 %v289_v13 }
  0x1c   : > { %500 = vpow2.f32 %v295_v14 }
  0x1d   : > { %502 = vpow2.f32 %v301_v15 }
  0x20   : > { %v497_v17 = vpop.eup %496 }
  0x21   : > { %v499_v18 = vpop.eup %498 }
  0x22   : > { %v501_v19 = vpop.eup %500  ;;  %v291_v20 = vadd.f32 %v499_v18, %v497_v17 }
  0x23   : > { %v503_v21 = vpop.eup %502 }
  0x24   : > { %v297_v23 = vadd.f32 %v501_v19, %v291_v20 }
  0x26   : > { %v303_v24 = vadd.f32 %v503_v21, %v297_v23 }
  0x28   : > { %504 = vlog2.f32 %v303_v24 }
  0x2e   : > { %v505_v28 = vpop.eup %504 }
  0x2f   : > { %v308_v29 = vmul.f32 0.6931472, %v505_v28 }
  0x31   : > { %v309_v31 = vadd.f32 %v308_v29, %v306_v27 }
  0x33   : > { %v310_v32 = vsub.f32 0.0, %v309_v31  ;;  %v314_v33 = vadd.f32 %v313_v30, %v309_v31 }
  0x35   : > { %v311_v34 = vmul.f32 1.442695, %v310_v32  ;;  %315 = vst [vmem:[%s577_s22] sm:$0x3] %v314_v33 }
  0x37   : > { %506 = vpow2.f32 %v311_v34 }
  0x3d   : > { %v507_v36 = vpop.eup %506 }
  0x3e   : > { %v317_v37 = vadd.f32 %v507_v36, %v316_v35 }
  0x40   : > { %318 = vst [vmem:[%s582_s25] sm:$0x3] %v317_v37 }
  0x41 PF: > { %s14_s14 = sadd.s32 1, %s530_s14   ;;  %s606_s12 = smov %s526_s13 }
  0x42   : > { %p11_p5 = scmp.ge.s32.totalorder %s14_s14, 4   ;;  %s607_s13 = smov %s609_s15 }
  0x44   :  { %13 = sbr.rel (!%p11_p5) target bundleno = 2 (0x2), region = 80 }

</bundles_post_ra>
